<compile_context>
chip_gen: v6e
topology: v6e:2x2x1
jax: 0.10.0
libtpu: 0.0.40
codegen_flags: <defaults>
</compile_context>

<pallas_src>
import math
import numpy as np
import jax
import jax.numpy as jnp
from jax.experimental import pallas as pl
from jax.experimental.pallas import tpu as pltpu


def _choose_batch_tile(B, T, F, itemsize=4):
    """Largest BB dividing B such that one x block is <= ~4 MiB (so the
    double-buffered pair is <= ~8 MiB on every TPU generation's default
    scoped VMEM), while keeping >= 2 grid steps when possible (v7x has 2
    TensorCores)."""
    cap = max(1, (4 << 20) // (T * F * itemsize))
    cap = min(cap, B)
    if B >= 4:
        cap = min(cap, B // 2)          # keep at least 2 grid steps
    for bb in range(cap, 0, -1):
        if B % bb == 0:
            return bb
    return 1


def _custom_att_block_kernel(x_ref, w_ref, b_ref, out_ref):
    """x_ref (BB,T,F) VMEM, w_ref (1,F) VMEM, b_ref (1,) SMEM -> out (BB,1,F)."""
    w = w_ref[...]                                       # (1, F)
    bias = b_ref[0]                                      # scalar from SMEM

    # Pass 1: alpha logits -> sigmoid -> normalized attention weights.
    # (F -> 1) projection as VPU multiply + XLU lane-reduce (MXU-hostile N=1).
    x = x_ref[...]                                       # (BB, T, F)
    logits = jnp.sum(x * w, axis=-1) + bias              # (BB, T); T on lanes
    dp = 1.0 / (1.0 + jnp.exp(-logits))                  # sigmoid, exact
    att = dp / jnp.sum(dp, axis=-1, keepdims=True)       # (BB, T), exact divide

    # Pass 2: weighted sum over time.  Re-read x from the ref so the tile is
    # not held live in vregs across both passes (bounds spills at large BB).
    x2 = x_ref[...]                                      # (BB, T, F)
    pooled = jnp.sum(x2 * att[:, :, None], axis=1, keepdims=True)   # (BB, 1, F)
    out_ref[...] = pooled.astype(out_ref.dtype)


def custom_att_block(x, w_alpha, b_alpha):
    """x: (B, T, F); w_alpha: (1, F) (PyTorch Linear(F,1).weight);
    b_alpha: (1,) (Linear bias). Returns (B, F)."""
    B, T, Feat = x.shape
    x = x.astype(jnp.float32)
    w = w_alpha.reshape(1, Feat).astype(jnp.float32)
    b = b_alpha.reshape(1).astype(jnp.float32)

    BB = _choose_batch_tile(B, T, Feat)

    out = pl.pallas_call(
        _custom_att_block_kernel,
        out_shape=jax.ShapeDtypeStruct((B, 1, Feat), jnp.float32),
        grid=(B // BB,),
        in_specs=[
            pl.BlockSpec((BB, T, Feat), lambda i: (i, 0, 0)),          # x tile
            pl.BlockSpec((1, Feat), lambda i: (0, 0)),                 # alpha weight
            pl.BlockSpec(memory_space=pltpu.MemorySpace.SMEM),         # alpha bias (scalar)
        ],
        out_specs=pl.BlockSpec((BB, 1, Feat), lambda i: (i, 0, 0)),
        compiler_params=pltpu.CompilerParams(
            dimension_semantics=("parallel",)),
    )(x, w, b)
    # (B, 1, F) -> (B, F): contiguous reshape, a layout no-op in XLA.
    return out.reshape(B, Feat)


def _reference(x, w_alpha, b_alpha):
    """Pure-JAX mirror of the PyTorch forward."""
    hp = jax.lax.Precision.HIGHEST
    logits = jnp.einsum("btf,of->bto", x, w_alpha, precision=hp) + b_alpha  # (B,T,1)
    dp = jax.nn.sigmoid(logits)
    att = dp / jnp.sum(dp, axis=1, keepdims=True)
    return jnp.sum(x * att, axis=1)                                         # (B, F)


if __name__ == "__main__":
    # classes_num is unused by the PyTorch module (only alpha = Linear(F, 1)).
    B, T, Feat = 16, 16, 256     # F multiple of 128 -> lane-dense output stores
    key = jax.random.PRNGKey(0)
    kx, kw, kb = jax.random.split(key, 3)

    x = jax.random.normal(kx, (B, T, Feat), jnp.float32)
    w_alpha = jax.random.normal(kw, (1, Feat), jnp.float32) / math.sqrt(Feat)
    b_alpha = jax.random.normal(kb, (1,), jnp.float32) * 0.02

    out = jax.jit(custom_att_block)(x, w_alpha, b_alpha)
    jax.block_until_ready(out)

    ref = _reference(x, w_alpha, b_alpha)
    assert out.shape == (B, Feat)
    np.testing.assert_allclose(np.asarray(out), np.asarray(ref), rtol=1e-4, atol=1e-4)
    print("KERNEL_OK")
</pallas_src>

<mosaic_0001>
module attributes {stable_mosaic.version = 11 : i64} {
  func.func @_custom_att_block_kernel(%arg0: i32, %arg1: memref<8x16x256xf32, #tpu.memory_space<vmem>>, %arg2: memref<1x256xf32, #tpu.memory_space<vmem>>, %arg3: memref<1xf32, #tpu.memory_space<smem>>, %arg4: memref<8x1x256xf32, #tpu.memory_space<vmem>>) attributes {dimension_semantics = [#tpu.dimension_semantics<parallel>], iteration_bounds = array<i64: 2>, scalar_prefetch = 0 : i64, scratch_operands = 0 : i64, tpu.core_type = #tpu.core_type<tc>, window_params = [{transform_indices = @transform_0, window_bounds = array<i64: 8, 16, 256>}, {pipeline_mode = #tpu.pipeline_mode<synchronous>, transform_indices = @transform_1, window_bounds = array<i64: 1, 256>}, {transform_indices = @transform_2, window_bounds = array<i64: 1>}, {transform_indices = @transform_3, window_bounds = array<i64: 8, 1, 256>}]} {
    %c0 = arith.constant 0 : index
    %c0_0 = arith.constant 0 : index
    %0 = vector.load %arg2[%c0, %c0_0] : memref<1x256xf32, #tpu.memory_space<vmem>>, vector<1x256xf32>
    %c0_1 = arith.constant 0 : index
    %1 = memref.load %arg3[%c0_1] : memref<1xf32, #tpu.memory_space<smem>>
    %c0_2 = arith.constant 0 : index
    %c0_3 = arith.constant 0 : index
    %c0_4 = arith.constant 0 : index
    %2 = vector.load %arg1[%c0_2, %c0_3, %c0_4] : memref<8x16x256xf32, #tpu.memory_space<vmem>>, vector<8x16x256xf32>
    %3 = vector.shape_cast %0 : vector<1x256xf32> to vector<1x1x256xf32>
    %4 = vector.broadcast %3 : vector<1x1x256xf32> to vector<8x16x256xf32>
    %5 = arith.mulf %2, %4 : vector<8x16x256xf32>
    %cst = arith.constant dense<0.000000e+00> : vector<8x16xf32>
    %6 = vector.multi_reduction <add>, %5, %cst [2] : vector<8x16x256xf32> to vector<8x16xf32>
    %7 = vector.broadcast %1 : f32 to vector<8x16xf32>
    %8 = arith.addf %6, %7 : vector<8x16xf32>
    %cst_5 = arith.constant 0.000000e+00 : f32
    %9 = vector.broadcast %cst_5 : f32 to vector<8x16xf32>
    %10 = arith.subf %9, %8 : vector<8x16xf32>
    %11 = math.exp %10 : vector<8x16xf32>
    %cst_6 = arith.constant 1.000000e+00 : f32
    %12 = vector.broadcast %cst_6 : f32 to vector<8x16xf32>
    %13 = arith.addf %12, %11 : vector<8x16xf32>
    %cst_7 = arith.constant 1.000000e+00 : f32
    %14 = vector.broadcast %cst_7 : f32 to vector<8x16xf32>
    %15 = arith.divf %14, %13 : vector<8x16xf32>
    %cst_8 = arith.constant dense<0.000000e+00> : vector<8xf32>
    %16 = vector.multi_reduction <add>, %15, %cst_8 [1] : vector<8x16xf32> to vector<8xf32>
    %17 = vector.shape_cast %16 : vector<8xf32> to vector<8x1xf32>
    %18 = vector.broadcast %17 : vector<8x1xf32> to vector<8x16xf32>
    %19 = arith.divf %15, %18 : vector<8x16xf32>
    %c0_9 = arith.constant 0 : index
    %c0_10 = arith.constant 0 : index
    %c0_11 = arith.constant 0 : index
    %20 = vector.load %arg1[%c0_9, %c0_10, %c0_11] : memref<8x16x256xf32, #tpu.memory_space<vmem>>, vector<8x16x256xf32>
    %21 = vector.shape_cast %19 : vector<8x16xf32> to vector<8x16x1xf32>
    %22 = vector.broadcast %21 : vector<8x16x1xf32> to vector<8x16x256xf32>
    %23 = arith.mulf %20, %22 : vector<8x16x256xf32>
    %cst_12 = arith.constant dense<0.000000e+00> : vector<8x256xf32>
    %24 = vector.multi_reduction <add>, %23, %cst_12 [1] : vector<8x16x256xf32> to vector<8x256xf32>
    %25 = vector.shape_cast %24 : vector<8x256xf32> to vector<8x1x256xf32>
    %c0_13 = arith.constant 0 : index
    %c0_14 = arith.constant 0 : index
    %c0_15 = arith.constant 0 : index
    %26 = vector.load %arg4[%c0_13, %c0_14, %c0_15] : memref<8x1x256xf32, #tpu.memory_space<vmem>>, vector<8x1x256xf32>
    tpu.vector_store %arg4[%c0_13, %c0_14, %c0_15], %25 {strides = array<i32>} : memref<8x1x256xf32, #tpu.memory_space<vmem>>, vector<8x1x256xf32>,
    return
  }
  func.func @transform_0(%arg0: i32) -> (i32, i32, i32) {
    %c0_i32 = arith.constant 0 : i32
    %c0_i32_0 = arith.constant 0 : i32
    %c0_i32_1 = arith.constant 0 : i32
    return %arg0, %c0_i32, %c0_i32_0 : i32, i32, i32
  }
  func.func @transform_1(%arg0: i32) -> (i32, i32) {
    %c0_i32 = arith.constant 0 : i32
    %c0_i32_0 = arith.constant 0 : i32
    %c0_i32_1 = arith.constant 0 : i32
    return %c0_i32, %c0_i32_0 : i32, i32
  }
  func.func @transform_2(%arg0: i32) -> i32 {
    %c0_i32 = arith.constant 0 : i32
    %c0_i32_0 = arith.constant 0 : i32
    return %c0_i32 : i32
  }
  func.func @transform_3(%arg0: i32) -> (i32, i32, i32) {
    %c0_i32 = arith.constant 0 : i32
    %c0_i32_0 = arith.constant 0 : i32
    %c0_i32_1 = arith.constant 0 : i32
    return %arg0, %c0_i32, %c0_i32_0 : i32, i32, i32
  }
}

</mosaic_0001>

<bundles_post_ra>
// kernel: custom_att_block.1
= control target key start
LH: loop header
LB: loop body
LE: loop exit
PB: predicated region body
PF: predicated region fallthrough
CT: control target
= control target key end

     0   :  { %s1748_s0 = inlined_call_operand.hbm [shape: f32[16,16,256], index: 0, kind: input, shape index: {}]   ;;  %s1749_s1 = inlined_call_operand.vmem [shape: f32[1,256], index: 1, kind: input, shape index: {}]   ;;  %s1750_s2 = inlined_call_operand.<no memory space> [shape: f32[1], index: 2, kind: input, shape index: {}]   ;;  %s1751_s3 = inlined_call_operand.vmem [shape: f32[16,1,256], index: 3, kind: output, shape index: {}]  }
   0x1   :  { %8 = sst [smem:[#allocation2]] %s1750_s2 }
   0x2   :  { %9 = vsyncpa [#allocation4], 0 }
   0x3   :  { %11 = vsyncpa [#allocation4 + $0x1], 0  ;;  %s1289_s14 = smov 0   ;;  %s1291_s15 = smov 0  }
   0x4   :  { %s1293_s16 = smov 0   ;;  %s1295_s17 = smov 0  }
   0x5 LB: > { %s1056_s2 = sadd.s32 4294967295, %s1259_s17   ;;  %s1309_s18 = sadd.s32 1, %s1259_s17   ;;  %s1259_s17 = sphi %s1295_s17, %s1789_s17   ;;  %s1255_s16 = sphi %s1293_s16, %s1788_s16   ;;  %s1251_s15 = sphi %s1291_s15, %s1787_s15   ;;  %s1247_s14 = sphi %s1289_s14, %s1786_s14  }
   0x6   : > { %s21_s19 = ssub.s32 %s1259_s17, %s1309_s18  ;;  %s24_s20 = sadd.s32 1, %s1255_s16 }
   0x7   : > { %p22_p0 = scmp.eq.s32.totalorder %s21_s19, 0  ;;  %p31_p1 = scmp.ne.s32.totalorder %s1255_s16, %s1251_s15 }
   0x8   : > { %p32_p2 = scmp.eq.s32.totalorder %s1259_s17, 0  ;;  %p37_p3 = scmp.ne.s32.totalorder %s1251_s15, %s1247_s14 }
   0x9   : > { %s1319_s21 = scalar_select %p22_p0, %s1255_s16, %s24_s20  }
   0xa   : > { %p33_p4 = por %p32_p2, %p31_p1  ;;  %p38_p5 = scmp.eq.s32.totalorder %s1056_s2, 0 }
   0xb   : > { %p1078_p6 = scmp.lt.s32.totalorder %s1259_s17, 2  ;;  %s135_s23 = sand.u32 1, %s1255_s16  }
   0xc   : > { %p1324_p7 = por %p38_p5, %p37_p3  ;;  %s1060_s24 = sshll.u32 %s135_s23, 8 }
   0xd   : > { %s1071_s25 = sshll.u32 %s1259_s17, 12  ;;  %s139_s29 = scalar_lea.vmem [#allocation3], %s1060_s24 }
   0xe   : > { %s1763_s22 = scalar_select %p1324_p7, 1, 0 }
   0xf   : > { %s1333_s28 = scalar_lea.hbm %s1748_s0, %s1071_s25  ;;  %s147_s30 = sshll.u32 %s139_s29, 4  ;;  %s1335_s30 = int_to_ptr.vmem [resolvable:$true] %s147_s30 }
  0x10   : > { %p1337_p8 = pnand %p1078_p6, %p33_p4  ;;  %s1342_s5 = scalar_lea.sflag [#allocation4], %s135_s23 }
  0x11   : > { %s1197_s6 = scalar_lea.hbm %s1333_s28, 4096  ;;  %s1202_s9 = scalar_lea.hbm %s1748_s0, 8192 }
  0x12   : > { %p1198_p10 = scmp.ne.s32.totalorder %s1333_s28, %s1197_s6  ;;  %p1199_p11 = pneg %p1337_p8 }
  0x13   : > { %p1203_p0 = scmp.lt.s32.totalorder %s1333_s28, %s1748_s0  ;;  %p1204_p1 = scmp.lt.s32.totalorder %s1202_s9, %s1197_s6 }
  0x14   : > { %p1200_p12 = pnand %p1199_p11, %p1198_p10 }
  0x15   : > { %p1205_p2 = por %p1204_p1, %p1203_p0 }
  0x16   : > { %p1201_p13 = pneg %p1200_p12 }
  0x18   : > { %p1206_p3 = pnand %p1205_p2, %p1201_p13 }
  0x1a   : > { %1209 = shalt.err (!%p1206_p3)
}
  0x1b   : > { %s1210_s12 = scalar_lea.vmem %s1335_s30, 4096  ;;  %s1261_s13 = smov [#allocation3]  }
  0x1c   : > { %p1211_p4 = scmp.ne.s32.totalorder %s1335_s30, %s1210_s12  ;;  %s1215_s14 = sshll.u32 %s1261_s13, 4  ;;  %s1216_s14 = int_to_ptr.vmem [resolvable:$false] %s1215_s14 }
  0x1d   : > { %s1217_s19 = scalar_lea.vmem %s1216_s14, 8192  ;;  %p1218_p10 = scmp.lt.s32.totalorder %s1335_s30, %s1216_s14 }
  0x1e   : > { %p1213_p5 = pnand %p1211_p4, %p1199_p11  ;;  %p1219_p12 = scmp.lt.s32.totalorder %s1217_s19, %s1210_s12 }
  0x20   : > { %p1214_p6 = pneg %p1213_p5  ;;  %p1220_p9 = por %p1219_p12, %p1218_p10 }
  0x22   : > { %p1221_p7 = pnand %p1220_p9, %p1214_p6 }
  0x24   : > { %1224 = shalt.err (!%p1221_p7)
}
  0x25   : > { %s1262_s20 = smov 256   ;;  %s1263_s23 = smov 16  }
  0x26   : > { %1077 = dma.hbm_to_vmem [thread:$0]  (!%p1337_p8), %s1333_s28, 4096, %s1335_s30, %s1342_s5, %s1262_s20, %s1262_s20, %s1263_s23  }
  0x27   : > { %p155_p11 = scmp.lt.s32.totalorder %s1259_s17, 3  ;;  %p1765_p13 = scmp.ge.s32.totalorder %s1259_s17, 1 }
  0x29   : > { %p156_p0 = pnand %p1765_p13, %p155_p11 }
  0x2b   : > { %159 = sbr.rel (%p156_p0) target bundleno = 622 (0x26e), region = 32 }
  0x30   : > { %s161_s24 = sand.u32 1, %s1251_s15   ;;  %p1766_p7 = scmp.ne.s32.totalorder %s1763_s22, 0 }
  0x31   : > { %s1065_s25 = sshll.u32 %s161_s24, 8  ;;  %s162_s26 = scalar_lea.sflag [#allocation4], %s161_s24 }
  0x32   : > { %s1367_s27 = scalar_lea.vmem [#allocation3], %s1065_s25 }
  0x33   : > { %1242 = dma.done.wait (%p1766_p7), %s162_s26, 4096  }
  0x34   : > { %1244 = vsyncadd (%p1766_p7), %s162_s26, 4294963200  ;;  %v1753_v0 = vlaneseq  ;;  %v195_v4 = vld [vmem:[%s1749_s1] sm:$0x3]  ;;  %v1385_v6 = vld [vmem:[%s1367_s27 + $0x28] sm:$0xff]  ;;  %s196_s22 = sld [smem:[#allocation2]]  ;;  %vm460_vm0 = vcmask 130112  }
  0x35   : > { %v1382_v5 = vld [vmem:[%s1367_s27 + $0x20] sm:$0xff]  ;;  %v1399_v10 = vld [vmem:[%s1367_s27 + $0x8] sm:$0xff]  ;;  %v1402_v11 = vld [vmem:[%s1367_s27 + $0x30] sm:$0xff]  ;;  %vm525_vm1 = vcmask 1041409   ;;  %vm527_vm2 = vcmask 1042434   ;;  %vm529_vm3 = vcmask 1043459  }
  0x36   : > { %v1374_v1 = vshrl.u32 %v1753_v0, 7  ;;  %v1396_v9 = vld [vmem:[%s1367_s27] sm:$0xff]  ;;  %v1405_v12 = vld [vmem:[%s1367_s27 + $0x38] sm:$0xff]  ;;  %v1408_v13 = vld [vmem:[%s1367_s27 + $0x10] sm:$0xff]  ;;  %vm531_vm4 = vcmask 1044484   ;;  %vm533_vm5 = vcmask 1045509  }
  0x37   : > { %v1411_v14 = vld [vmem:[%s1367_s27 + $0x18] sm:$0xff]  ;;  %v1422_v19 = vld [vmem:[%s1367_s27 + $0x50] sm:$0xff]  ;;  %v1436_v25 = vld [vmem:[%s1367_s27 + $0x40] sm:$0xff]  ;;  %vm535_vm6 = vcmask 1046534   ;;  %vm537_vm7 = vcmask 1047559   ;;  %vm540_vm8 = vcmask 130048  }
  0x38   : > { %v1755_v2 = vsub.s32 0, %v1374_v1  ;;  %v1754_v3 = vsub.s32 1, %v1374_v1  ;;  %v1425_v20 = vld [vmem:[%s1367_s27 + $0x58] sm:$0xff]  ;;  %v1439_v26 = vld [vmem:[%s1367_s27 + $0x48] sm:$0xff]  ;;  %v1450_v35 = vld [vmem:[%s1367_s27 + $0x70] sm:$0xff]  ;;  %s1066_s30 = sshll.u32 %s1056_s2, 3 }
  0x39   : > { %v1453_v36 = vld [vmem:[%s1367_s27 + $0x78] sm:$0xff]  ;;  %v1456_v37 = vld [vmem:[%s1367_s27 + $0x60] sm:$0xff]  ;;  %v1459_v38 = vld [vmem:[%s1367_s27 + $0x68] sm:$0xff]  ;;  %p190_p8 = scmp.lt.s32.totalorder %s1066_s30, 15 }
  0x3a   : > { %v1389_v7 = vrot.slane %v195_v4, %v1755_v2  ;;  %v1393_v8 = vrot.slane %v195_v4, %v1754_v3  ;;  %v1470_v45 = vld [vmem:[%s1367_s27 + $0x90] sm:$0xff]  ;;  %v1473_v46 = vld [vmem:[%s1367_s27 + $0x98] sm:$0xff]  ;;  %v1476_v47 = vld [vmem:[%s1367_s27 + $0x80] sm:$0xff] }
  0x3b   : > { %v1479_v48 = vld [vmem:[%s1367_s27 + $0x88] sm:$0xff]  ;;  %v1490_v55 = vld [vmem:[%s1367_s27 + $0xb0] sm:$0xff]  ;;  %v1493_v56 = vld [vmem:[%s1367_s27 + $0xb8] sm:$0xff]  ;;  %s1791_s30 = smov (!%p190_p8, %s1066_s30), 15 }
  0x3c   : > { %v244_v15 = vmul.f32 %v1389_v7, %v1382_v5  ;;  %v245_v16 = vmul.f32 %v1393_v8, %v1385_v6  ;;  %v240_v17 = vmul.f32 %v1389_v7, %v1396_v9  ;;  %v241_v18 = vmul.f32 %v1393_v8, %v1399_v10  ;;  %v1496_v57 = vld [vmem:[%s1367_s27 + $0xa0] sm:$0xff]  ;;  %v1499_v58 = vld [vmem:[%s1367_s27 + $0xa8] sm:$0xff]  ;;  %s1067_s17 = sshll.u32 %s1791_s30, 1 }
  0x3d   : > { %v246_v21 = vmul.f32 %v1389_v7, %v1402_v11  ;;  %v247_v22 = vmul.f32 %v1393_v8, %v1405_v12  ;;  %v242_v23 = vmul.f32 %v1389_v7, %v1408_v13  ;;  %v243_v24 = vmul.f32 %v1393_v8, %v1411_v14  ;;  %s1669_s5 = scalar_lea.vmem %s1751_s3, %s1067_s17 }
  0x3e   : > { %v278_v27 = vadd.f32 %v245_v16, %v244_v15  ;;  %v272_v28 = vadd.f32 %v241_v18, %v240_v17  ;;  %v250_v30 = vmul.f32 %v1389_v7, %v1422_v19  ;;  %v251_v31 = vmul.f32 %v1393_v8, %v1425_v20  ;;  %v1510_v15 = vld [vmem:[%s1367_s27 + $0xd0] sm:$0xff]  ;;  %v1513_v16 = vld [vmem:[%s1367_s27 + $0xd8] sm:$0xff]  ;;  %v1516_v17 = vld [vmem:[%s1367_s27 + $0xc0] sm:$0xff] }
  0x3f   : > { %v281_v29 = vadd.f32 %v247_v22, %v246_v21  ;;  %v275_v32 = vadd.f32 %v243_v24, %v242_v23  ;;  %v248_v33 = vmul.f32 %v1389_v7, %v1436_v25  ;;  %v249_v34 = vmul.f32 %v1393_v8, %v1439_v26  ;;  %1767 = vst [vmem:[#allocation6_spill] sm:$0xff] %v1510_v15  ;;  %v1519_v18 = vld [vmem:[%s1367_s27 + $0xc8] sm:$0xff] }
  0x40   : > { %279 = vadd.xlane.f32.xlu1 %v278_v27  ;;  %273 = vadd.xlane.f32.xlu0 %v272_v28  ;;  %v287_v39 = vadd.f32 %v251_v31, %v250_v30  ;;  %v254_v40 = vmul.f32 %v1389_v7, %v1450_v35  ;;  %v255_v41 = vmul.f32 %v1393_v8, %v1453_v36  ;;  %v1533_v30 = vld [vmem:[%s1367_s27 + $0xf8] sm:$0xff]  ;;  %v1536_v31 = vld [vmem:[%s1367_s27 + $0xe0] sm:$0xff] }
  0x41   : > { %v284_v42 = vadd.f32 %v249_v34, %v248_v33  ;;  %v252_v43 = vmul.f32 %v1389_v7, %v1456_v37  ;;  %v253_v44 = vmul.f32 %v1393_v8, %v1459_v38  ;;  %v258_v50 = vmul.f32 %v1389_v7, %v1470_v45  ;;  %1768 = vst [vmem:[#allocation7_spill] sm:$0xff] %v1513_v16 }
  0x42   : > { %v293_v49 = vadd.f32 %v255_v41, %v254_v40  ;;  %v259_v51 = vmul.f32 %v1393_v8, %v1473_v46  ;;  %v256_v53 = vmul.f32 %v1389_v7, %v1476_v47  ;;  %v257_v54 = vmul.f32 %v1393_v8, %v1479_v48  ;;  %1769 = vst [vmem:[#allocation8_spill] sm:$0xff] %v1519_v18 }
  0x43   : > { %v290_v52 = vadd.f32 %v253_v44, %v252_v43  ;;  %v262_v59 = vmul.f32 %v1389_v7, %v1490_v55  ;;  %v263_v60 = vmul.f32 %v1393_v8, %v1493_v56  ;;  %v260_v61 = vmul.f32 %v1389_v7, %v1496_v57  ;;  %1771 = vst [vmem:[#allocation10_spill] sm:$0xff] %v1533_v30 }
  0x44   : > { %282 = vadd.xlane.f32.xlu1 %v281_v29  ;;  %276 = vadd.xlane.f32.xlu0 %v275_v32  ;;  %v299_v62 = vadd.f32 %v259_v51, %v258_v50  ;;  %v296_v63 = vadd.f32 %v257_v54, %v256_v53  ;;  %v261_v4 = vmul.f32 %v1393_v8, %v1499_v58  ;;  %v1530_v29 = vld [vmem:[%s1367_s27 + $0xf0] sm:$0xff]  ;;  %v1539_v32 = vld [vmem:[%s1367_s27 + $0xe8] sm:$0xff] }
  0x45   : > { %v305_v21 = vadd.f32 %v263_v60, %v262_v59  ;;  %v266_v22 = vmul.f32 %v1389_v7, %v1510_v15  ;;  %v267_v23 = vmul.f32 %v1393_v8, %v1513_v16  ;;  %v264_v27 = vmul.f32 %v1389_v7, %v1516_v17  ;;  %1770 = vst [vmem:[#allocation9_spill] sm:$0xff] %v1530_v29 }
  0x46   : > { %v302_v24 = vadd.f32 %v261_v4, %v260_v61  ;;  %v265_v28 = vmul.f32 %v1393_v8, %v1519_v18  ;;  %1772 = vst [vmem:[#allocation11_spill] sm:$0xff] %v1536_v31  ;;  %1773 = vst [vmem:[#allocation12_spill] sm:$0xff] %v1539_v32  ;;  %v270_v34 = vmul.f32 %v1389_v7, %v1530_v29 }
  0x47   : > { %v311_v33 = vadd.f32 %v267_v23, %v266_v22  ;;  %v268_v41 = vmul.f32 %v1389_v7, %v1536_v31 }
  0x48   : > { %288 = vadd.xlane.f32.xlu1 %v287_v39  ;;  %285 = vadd.xlane.f32.xlu0 %v284_v42  ;;  %v271_v39 = vmul.f32 %v1393_v8, %v1533_v30  ;;  %v308_v40 = vadd.f32 %v265_v28, %v264_v27  ;;  %v269_v42 = vmul.f32 %v1393_v8, %v1539_v32 }
  0x4a   : > { %v317_v43 = vadd.f32 %v271_v39, %v270_v34  ;;  %v314_v44 = vadd.f32 %v269_v42, %v268_v41 }
  0x4c   : > { %294 = vadd.xlane.f32.xlu1 %v293_v49  ;;  %291 = vadd.xlane.f32.xlu0 %v290_v52  ;;  %v1549_v49 = vstv %s196_s22 }
  0x50   : > { %300 = vadd.xlane.f32.xlu1 %v299_v62  ;;  %297 = vadd.xlane.f32.xlu0 %v296_v63 }
  0x54   : > { %306 = vadd.xlane.f32.xlu1 %v305_v21  ;;  %303 = vadd.xlane.f32.xlu0 %v302_v24 }
  0x58   : > { %312 = vadd.xlane.f32.xlu1 %v311_v33  ;;  %309 = vadd.xlane.f32.xlu0 %v308_v40 }
  0x5c   : > { %318 = vadd.xlane.f32.xlu1 %v317_v43  ;;  %315 = vadd.xlane.f32.xlu0 %v314_v44 }
  0xc9   : > { %v280_v50 = vpop.xlane.xlu1 %279  ;;  %v274_v51 = vpop.xlane.xlu0 %273 }
  0xca   : > { %v323_v52 = vadd.f32 %v1549_v49, %v280_v50  ;;  %v321_v53 = vadd.f32 %v1549_v49, %v274_v51 }
  0xcc   : > { %v339_v54 = vsub.f32 0.0, %v323_v52  ;;  %v337_v7 = vsub.f32 0.0, %v321_v53 }
  0xcd   : > { %v283_v59 = vpop.xlane.xlu1 %282  ;;  %v277_v60 = vpop.xlane.xlu0 %276 }
  0xce   : > { %v324_v8 = vadd.f32 %v1549_v49, %v283_v59  ;;  %v322_v61 = vadd.f32 %v1549_v49, %v277_v60  ;;  %v357_v62 = vmul.f32 1.442695, %v339_v54  ;;  %v353_v4 = vmul.f32 1.442695, %v337_v7 }
  0xd0   : > { %v340_v63 = vsub.f32 0.0, %v324_v8  ;;  %v338_v21 = vsub.f32 0.0, %v322_v61  ;;  %1117 = vpow2.f32 %v357_v62 }
  0xd1   : > { %v289_v22 = vpop.xlane.xlu1 %288  ;;  %v286_v23 = vpop.xlane.xlu0 %285  ;;  %1119 = vpow2.f32 %v353_v4 }
  0xd2   : > { %v326_v24 = vadd.f32 %v1549_v49, %v289_v22  ;;  %v325_v27 = vadd.f32 %v1549_v49, %v286_v23  ;;  %v359_v28 = vmul.f32 1.442695, %v340_v63  ;;  %v355_v34 = vmul.f32 1.442695, %v338_v21 }
  0xd4   : > { %v342_v33 = vsub.f32 0.0, %v326_v24  ;;  %v341_v39 = vsub.f32 0.0, %v325_v27  ;;  %1121 = vpow2.f32 %v359_v28 }
  0xd5   : > { %v295_v40 = vpop.xlane.xlu1 %294  ;;  %v292_v41 = vpop.xlane.xlu0 %291  ;;  %1123 = vpow2.f32 %v355_v34 }
  0xd6   : > { %v328_v42 = vadd.f32 %v1549_v49, %v295_v40  ;;  %v327_v43 = vadd.f32 %v1549_v49, %v292_v41  ;;  %v363_v44 = vmul.f32 1.442695, %v342_v33  ;;  %v361_v52 = vmul.f32 1.442695, %v341_v39 }
  0xd8   : > { %v344_v50 = vsub.f32 0.0, %v328_v42  ;;  %v343_v51 = vsub.f32 0.0, %v327_v43  ;;  %1125 = vpow2.f32 %v363_v44 }
  0xd9   : > { %v301_v53 = vpop.xlane.xlu1 %300  ;;  %v298_v54 = vpop.xlane.xlu0 %297  ;;  %1127 = vpow2.f32 %v361_v52 }
  0xda   : > { %v367_v7 = vmul.f32 1.442695, %v344_v50  ;;  %v330_v59 = vadd.f32 %v1549_v49, %v301_v53  ;;  %v329_v60 = vadd.f32 %v1549_v49, %v298_v54  ;;  %v365_v8 = vmul.f32 1.442695, %v343_v51 }
  0xdc   : > { %v346_v61 = vsub.f32 0.0, %v330_v59  ;;  %v345_v62 = vsub.f32 0.0, %v329_v60  ;;  %1129 = vpow2.f32 %v367_v7 }
  0xdd   : > { %v307_v63 = vpop.xlane.xlu1 %306  ;;  %v304_v4 = vpop.xlane.xlu0 %303  ;;  %1131 = vpow2.f32 %v365_v8 }
  0xde   : > { %v371_v21 = vmul.f32 1.442695, %v346_v61  ;;  %v332_v22 = vadd.f32 %v1549_v49, %v307_v63  ;;  %v369_v23 = vmul.f32 1.442695, %v345_v62  ;;  %v331_v24 = vadd.f32 %v1549_v49, %v304_v4  ;;  %v1118_v28 = vpop.eup %1117 }
  0xdf   : > { %v1120_v40 = vpop.eup %1119  ;;  %v387_v50 = vadd.f32 1.0, %v1118_v28 }
  0xe0   : > { %v348_v27 = vsub.f32 0.0, %v332_v22  ;;  %v347_v33 = vsub.f32 0.0, %v331_v24  ;;  %1133 = vpow2.f32 %v371_v21  ;;  %v385_v53 = vadd.f32 1.0, %v1120_v40 }
  0xe1   : > { %v313_v34 = vpop.xlane.xlu1 %312  ;;  %v310_v39 = vpop.xlane.xlu0 %309  ;;  %1135 = vpow2.f32 %v369_v23 }
  0xe2   : > { %v375_v41 = vmul.f32 1.442695, %v348_v27  ;;  %v334_v42 = vadd.f32 %v1549_v49, %v313_v34  ;;  %v373_v43 = vmul.f32 1.442695, %v347_v33  ;;  %v333_v44 = vadd.f32 %v1549_v49, %v310_v39  ;;  %v1122_v52 = vpop.eup %1121 }
  0xe3   : > { %v1124_v60 = vpop.eup %1123  ;;  %v388_v4 = vadd.f32 1.0, %v1122_v52 }
  0xe4   : > { %v350_v51 = vsub.f32 0.0, %v334_v42  ;;  %v349_v54 = vsub.f32 0.0, %v333_v44  ;;  %1137 = vpow2.f32 %v375_v41  ;;  %v386_v23 = vadd.f32 1.0, %v1124_v60 }
  0xe5   : > { %v319_v7 = vpop.xlane.xlu1 %318  ;;  %v316_v59 = vpop.xlane.xlu0 %315  ;;  %1139 = vpow2.f32 %v373_v43 }
  0xe6   : > { %v379_v8 = vmul.f32 1.442695, %v350_v51  ;;  %v336_v61 = vadd.f32 %v1549_v49, %v319_v7  ;;  %v377_v62 = vmul.f32 1.442695, %v349_v54  ;;  %v335_v63 = vadd.f32 %v1549_v49, %v316_v59  ;;  %v1126_v22 = vpop.eup %1125 }
  0xe7   : > { %1141 = vrcp.f32 %v387_v50  ;;  %v1128_v27 = vpop.eup %1127  ;;  %v390_v40 = vadd.f32 1.0, %v1126_v22 }
  0xe8   : > { %v352_v21 = vsub.f32 0.0, %v336_v61  ;;  %1143 = vrcp.f32 %v385_v53  ;;  %v351_v24 = vsub.f32 0.0, %v335_v63  ;;  %v389_v41 = vadd.f32 1.0, %v1128_v27 }
  0xe9   : > { %1145 = vpow2.f32 %v379_v8  ;;  %v1130_v33 = vpop.eup %1129 }
  0xea   : > { %v383_v28 = vmul.f32 1.442695, %v352_v21  ;;  %1147 = vpow2.f32 %v377_v62  ;;  %v381_v34 = vmul.f32 1.442695, %v351_v24  ;;  %v1132_v39 = vpop.eup %1131  ;;  %v392_v42 = vadd.f32 1.0, %v1130_v33 }
  0xeb   : > { %1149 = vrcp.f32 %v388_v4  ;;  %v391_v43 = vadd.f32 1.0, %v1132_v39  ;;  %v450_v4 = vand.u32 127, %v1753_v0 }
  0xec   : > { %1151 = vrcp.f32 %v386_v23 }
  0xed   : > { %1153 = vpow2.f32 %v383_v28  ;;  %v1134_v49 = vpop.eup %1133  ;;  %v455_v24 = vadd.s32 4294967288, %v450_v4 }
  0xee   : > { %1155 = vpow2.f32 %v381_v34  ;;  %v1136_v44 = vpop.eup %1135  ;;  %v394_v50 = vadd.f32 1.0, %v1134_v49 }
  0xef   : > { %1157 = vrcp.f32 %v390_v40  ;;  %v393_v51 = vadd.f32 1.0, %v1136_v44 }
  0xf0   : > { %1159 = vrcp.f32 %v389_v41  ;;  %v458_v41 = vsub.s32 %v455_v24, %v1374_v1 }
  0xf1   : > { %1161 = vrcp.f32 %v392_v42  ;;  %v1138_v52 = vpop.eup %1137 }
  0xf2   : > { %1163 = vrcp.f32 %v391_v43  ;;  %v1140_v53 = vpop.eup %1139  ;;  %v396_v54 = vadd.f32 1.0, %v1138_v52  ;;  %v453_v43 = vsub.s32 %v450_v4, %v1374_v1 }
  0xf3   : > { %1165 = vrcp.f32 %v394_v50  ;;  %v395_v59 = vadd.f32 1.0, %v1140_v53 }
  0xf4   : > { %v1567_v7 = vpop.eup %1141  ;;  %1167 = vrcp.f32 %v393_v51 }
  0xf5   : > { %v1569_v60 = vpop.eup %1143  ;;  %1169 = vrcp.f32 %v396_v54 }
  0xf6   : > { %v1146_v8 = vpop.eup %1145  ;;  %1171 = vrcp.f32 %v395_v59 }
  0xf7   : > { %v1148_v61 = vpop.eup %1147  ;;  %v398_v62 = vadd.f32 1.0, %v1146_v8  ;;  %v465_v8 = vrot.slane %v1567_v7, %v453_v43 }
  0xf8   : > { %v1571_v63 = vpop.eup %1149  ;;  %v397_v21 = vadd.f32 1.0, %v1148_v61  ;;  %v454_v61 = vrot.slane %v1569_v60, %v453_v43 }
  0xf9   : > { %v1574_v22 = vpop.eup %1151  ;;  %1173 = vrcp.f32 %v398_v62  ;;  %v469_v51 = vrot.slane %v1571_v63, %v458_v41 }
  0xfa   : > { %v1154_v23 = vpop.eup %1153  ;;  %1175 = vrcp.f32 %v397_v21  ;;  %v459_v52 = vrot.slane %v1574_v22, %v458_v41 }
  0xfb   : > { %v1156_v27 = vpop.eup %1155  ;;  %v400_v28 = vadd.f32 1.0, %v1154_v23 }
  0xfc   : > { %v1576_v33 = vpop.eup %1157  ;;  %v399_v34 = vadd.f32 1.0, %v1156_v27  ;;  %v461_v27 = vsel %vm460_vm0, %v459_v52, %v454_v61 }
  0xfd   : > { %v1578_v39 = vpop.eup %1159  ;;  %1177 = vrcp.f32 %v400_v28  ;;  %v478_v59 = vrot.slane %v1576_v33, %v458_v41  ;;  %v470_v28 = vsel %vm460_vm0, %v469_v51, %v465_v8 }
  0xfe   : > { %v1580_v40 = vpop.eup %1161  ;;  %1179 = vrcp.f32 %v399_v34  ;;  %v474_v54 = vrot.slane %v1578_v39, %v453_v43  ;;  %v526_v61 = vsel %vm525_vm1, %v470_v28, %v461_v27 }
  0xff   : > { %v1583_v42 = vpop.eup %1163  ;;  %v487_v4 = vrot.slane %v1580_v40, %v458_v41 }
 0x100   : > { %v1585_v49 = vpop.eup %1165  ;;  %v483_v62 = vrot.slane %v1583_v42, %v453_v43  ;;  %v479_v2 = vsel %vm460_vm0, %v478_v59, %v474_v54 }
 0x101   : > { %v1588_v44 = vpop.eup %1167  ;;  %v496_v23 = vrot.slane %v1585_v49, %v458_v41  ;;  %v528_v31 = vsel %vm527_vm2, %v479_v2, %v526_v61  ;;  %v567_v2 = vsub.s32 5, %v1374_v1 }
 0x102   : > { %v1590_v50 = vpop.eup %1169  ;;  %v492_v21 = vrot.slane %v1588_v44, %v453_v43  ;;  %v488_v29 = vsel %vm460_vm0, %v487_v4, %v483_v62 }
 0x103   : > { %v1594_v53 = vpop.eup %1171  ;;  %v505_v0 = vrot.slane %v1590_v50, %v458_v41  ;;  %v530_v15 = vsel %vm529_vm3, %v488_v29, %v528_v31  ;;  %v1774_v29 = vsub.s32 0, %v1374_v1 }
 0x104   : > { %v501_v34 = vrot.slane %v1594_v53, %v453_v43  ;;  %v497_v52 = vsel %vm460_vm0, %v496_v23, %v492_v21 }
 0x105   : > { %v532_v4 = vsel %vm531_vm4, %v497_v52, %v530_v15  ;;  %v1775_v15 = vsub.s32 1, %v1374_v1  ;;  %v555_v52 = vsub.s32 2, %v1374_v1 }
 0x106   : > { %v1604_v24 = vpop.eup %1173  ;;  %v506_v8 = vsel %vm460_vm0, %v505_v0, %v501_v34  ;;  %v1264_v0 = vmov 0  }
 0x107   : > { %v1610_v3 = vpop.eup %1175  ;;  %v514_v30 = vrot.slane %v1604_v24, %v458_v41  ;;  %v534_v18 = vsel %vm533_vm5, %v506_v8, %v532_v4  ;;  %1116 = vset.pattern.permute.xlu0 %v1264_v0  ;;  %1115 = vset.pattern.permute.xlu1 %v1264_v0 }
 0x108   : > { %v510_v32 = vrot.slane %v1610_v3, %v453_v43 }
 0x10a   : > { %v1617_v51 = vpop.eup %1177  ;;  %v515_v54 = vsel %vm460_vm0, %v514_v30, %v510_v32 }
 0x10b   : > { %v1180_v16 = vpop.eup %1179  ;;  %v523_v59 = vrot.slane %v1617_v51, %v458_v41  ;;  %v536_v23 = vsel %vm535_vm6, %v515_v54, %v534_v18  ;;  %v575_v18 = vsub.s32 7, %v1374_v1  ;;  %v559_v54 = vsub.s32 3, %v1374_v1 }
 0x10c   : > { %v519_v62 = vrot.slane %v1180_v16, %v453_v43  ;;  %v571_v43 = vsub.s32 6, %v1374_v1 }
 0x10e   : > { %v524_v21 = vsel %vm460_vm0, %v523_v59, %v519_v62 }
 0x10f   : > { %v538_v27 = vsel %vm537_vm7, %v524_v21, %v536_v23 }
 0x110   : > { %v541_v28 = vsel %vm540_vm8, %v538_v27, 0.0 }
 0x111   : > { %542 = vadd.xlane.f32.xlu0 %v541_v28 }
 0x19a   : > { %v543_v30 = vpop.xlane.xlu0 %542 }
 0x19b   : > { %v548_v31 = vrot.slane %v543_v30, %v1774_v29  ;;  %v568_v32 = vrot.slane %v543_v30, %v567_v2  ;;  %v552_v41 = vrot.slane %v543_v30, %v1775_v15  ;;  %v572_v34 = vrot.slane %v543_v30, %v571_v43 }
 0x19c   : > { %v576_v61 = vrot.slane %v543_v30, %v575_v18  ;;  %v556_v8 = vrot.slane %v543_v30, %v555_v52  ;;  %v560_v23 = vrot.slane %v543_v30, %v559_v54  ;;  %v563_v2 = vsub.s32 4, %v1374_v1 }
 0x19d   : > { %1181 = vrcp.f32 %v548_v31 }
 0x19e   : > { %1183 = vrcp.f32 %v568_v32 }
 0x19f   : > { %1185 = vrcp.f32 %v552_v41 }
 0x1a0   : > { %1187 = vrcp.f32 %v572_v34 }
 0x1a1   : > { %1189 = vrcp.f32 %v576_v61 }
 0x1a2   : > { %1191 = vrcp.f32 %v556_v8 }
 0x1a3   : > { %1193 = vrcp.f32 %v560_v23 }
 0x1aa   : > { %v1182_v59 = vpop.eup %1181 }
 0x1ab   : > { %v1184_v62 = vpop.eup %1183  ;;  %v587_v4 = vmul.f32 %v1182_v59, %v1574_v22  ;;  %v586_v21 = vmul.f32 %v1182_v59, %v1569_v60  ;;  %v564_v60 = vrot.slane %v543_v30, %v563_v2 }
 0x1ac   : > { %v1186_v27 = vpop.eup %1185  ;;  %v601_v28 = vmul.f32 %v1184_v62, %v1594_v53 }
 0x1ad   : > { %616 = vperm.xlu0 %1116, %v587_v4   ;;  %611 = vperm.xlu1 %1115, %v586_v21   ;;  %v589_v0 = vmul.f32 %v1186_v27, %v1567_v7  ;;  %v1188_v29 = vpop.eup %1187  ;;  %v590_v22 = vmul.f32 %v1186_v27, %v1571_v63  ;;  %1195 = vrcp.f32 %v564_v60 }
 0x1ae   : > { %v1190_v31 = vpop.eup %1189  ;;  %v604_v32 = vmul.f32 %v1188_v29, %v1610_v3 }
 0x1af   : > { %v1192_v15 = vpop.eup %1191  ;;  %v607_v41 = vmul.f32 %v1190_v31, %v1180_v16 }
 0x1b0   : > { %v592_v53 = vmul.f32 %v1192_v15, %v1578_v39  ;;  %v593_v7 = vmul.f32 %v1192_v15, %v1576_v33  ;;  %v1194_v43 = vpop.eup %1193  ;;  %v602_v39 = vmul.f32 %v1184_v62, %v1590_v50  ;;  %v605_v33 = vmul.f32 %v1188_v29, %v1604_v24 }
 0x1b1   : > { %661 = vperm.xlu0 %1116, %v601_v28   ;;  %621 = vperm.xlu1 %1115, %v589_v0   ;;  %v595_v18 = vmul.f32 %v1194_v43, %v1583_v42  ;;  %v596_v3 = vmul.f32 %v1194_v43, %v1580_v40  ;;  %v608_v42 = vmul.f32 %v1190_v31, %v1617_v51  ;;  %v1265_v24 = vmov 1966171168  }
 0x1b2   : > { %v851_v51 = vunpack.c.l.s4 %v1265_v24 }
 0x1b4   : > { %v852_v0 = vunpack.c.0.s8 %v851_v51 }
 0x1b5   : > { %671 = vperm.xlu0 %1116, %v604_v32   ;;  %626 = vperm.xlu1 %1115, %v590_v22  }
 0x1b9   : > { %681 = vperm.xlu0 %1116, %v607_v41   ;;  %631 = vperm.xlu1 %1115, %v592_v53  }
 0x1ba   : > { %v1196_v63 = vpop.eup %1195 }
 0x1bb   : > { %v598_v30 = vmul.f32 %v1196_v63, %v1588_v44  ;;  %v599_v16 = vmul.f32 %v1196_v63, %v1585_v49 }
 0x1bd   : > { %636 = vperm.xlu1 %1115, %v593_v7   ;;  %v1659_v7 = vsub.s32 %v852_v0, %v1374_v1 }
 0x1c1   : > { %641 = vperm.xlu1 %1115, %v595_v18  }
 0x1c5   : > { %646 = vperm.xlu1 %1115, %v596_v3  }
 0x1c9   : > { %651 = vperm.xlu1 %1115, %v598_v30  }
 0x1cd   : > { %656 = vperm.xlu1 %1115, %v599_v16  }
 0x1d1   : > { %666 = vperm.xlu1 %1115, %v602_v39  }
 0x1d5   : > { %676 = vperm.xlu1 %1115, %v605_v33  }
 0x1d9   : > { %686 = vperm.xlu1 %1115, %v608_v42  }
 0x228   : > { %v617_v34 = vpop.permute.xlu0 %616  ;;  %v612_v40 = vpop.permute.xlu1 %611 }
 0x229   : > { %v691_v52 = vmul.f32 %v617_v34, %v1408_v13  ;;  %v692_v44 = vmul.f32 %v617_v34, %v1411_v14  ;;  %v689_v61 = vmul.f32 %v612_v40, %v1396_v9  ;;  %v690_v49 = vmul.f32 %v612_v40, %v1399_v10 }
 0x22b   : > { %v721_v8 = vadd.f32 %v691_v52, %v689_v61  ;;  %v728_v50 = vadd.f32 %v692_v44, %v690_v49 }
 0x22c   : > { %v622_v54 = vpop.permute.xlu1 %621 }
 0x22d   : > { %v722_v59 = vrot.slane %v721_v8, 4  ;;  %v729_v62 = vrot.slane %v728_v50, 4  ;;  %v693_v14 = vmul.f32 %v622_v54, %v1382_v5  ;;  %v694_v9 = vmul.f32 %v622_v54, %v1385_v6 }
 0x22f   : > { %v723_v4 = vadd.f32 %v722_v59, %v721_v8  ;;  %v730_v21 = vadd.f32 %v729_v62, %v728_v50 }
 0x230   : > { %v627_v23 = vpop.permute.xlu1 %626 }
 0x231   : > { %v724_v13 = vrot.slane %v723_v4, 2  ;;  %v731_v27 = vrot.slane %v730_v21, 2  ;;  %v695_v10 = vmul.f32 %v627_v23, %v1402_v11  ;;  %v696_v28 = vmul.f32 %v627_v23, %v1405_v12 }
 0x233   : > { %v725_v2 = vadd.f32 %v724_v13, %v723_v4  ;;  %v732_v29 = vadd.f32 %v731_v27, %v730_v21  ;;  %v735_v31 = vadd.f32 %v695_v10, %v693_v14  ;;  %v742_v32 = vadd.f32 %v696_v28, %v694_v9  ;;  %v662_v9 = vpop.permute.xlu0 %661 }
 0x234   : > { %v632_v22 = vpop.permute.xlu1 %631 }
 0x235   : > { %v726_v60 = vrot.slane %v725_v2, 1  ;;  %v733_v15 = vrot.slane %v732_v29, 1  ;;  %v736_v41 = vrot.slane %v735_v31, 4  ;;  %v743_v53 = vrot.slane %v742_v32, 4 }
 0x236   : > { %v697_v12 = vmul.f32 %v632_v22, %v1436_v25  ;;  %v698_v63 = vmul.f32 %v632_v22, %v1439_v26  ;;  %v1776_v25 = vlaneseq }
 0x237   : > { %v727_v5 = vadd.f32 %v726_v60, %v725_v2  ;;  %v734_v6 = vadd.f32 %v733_v15, %v732_v29  ;;  %v737_v43 = vadd.f32 %v736_v41, %v735_v31  ;;  %v744_v11 = vadd.f32 %v743_v53, %v742_v32 }
 0x238   : > { %v637_v18 = vpop.permute.xlu1 %636  ;;  %vm1672_vm9 = vcmp.lt.s32.totalorder %v1776_v25, 256 }
 0x239   : > { %v849_v3 = vcombine.low %v727_v5, %v734_v6  ;;  %v699_v30 = vmul.f32 %v637_v18, %v1422_v19  ;;  %v700_v16 = vmul.f32 %v637_v18, %v1425_v20  ;;  %v738_v39 = vrot.slane %v737_v43, 2  ;;  %v672_v6 = vpop.permute.xlu0 %671 }
 0x23a   : > { %v745_v33 = vrot.slane %v744_v11, 2 }
 0x23b   : > { %v856_v1 = vrot.slane %v849_v3, %v1659_v7  ;;  %v749_v42 = vadd.f32 %v699_v30, %v697_v12  ;;  %v756_v34 = vadd.f32 %v700_v16, %v698_v63  ;;  %v739_v19 = vadd.f32 %v738_v39, %v737_v43 }
 0x23c   : > { %v746_v26 = vadd.f32 %v745_v33, %v744_v11  ;;  %v642_v20 = vpop.permute.xlu1 %641 }
 0x23d   : > { %v863_v52 = vrot.slane %v856_v1, %v1659_v7  ;;  %v750_v44 = vrot.slane %v749_v42, 4  ;;  %v757_v61 = vrot.slane %v756_v34, 4  ;;  %v740_v49 = vrot.slane %v739_v19, 1 }
 0x23e   : > { %v747_v8 = vrot.slane %v746_v26, 1  ;;  %v701_v24 = vmul.f32 %v642_v20, %v1456_v37  ;;  %v702_v51 = vmul.f32 %v642_v20, %v1459_v38  ;;  %v709_v1 = vmul.f32 %v662_v9, %v1496_v57 }
 0x23f   : > { %981 = vst.msk [vmem:[%s1669_s5] sm:$0x3] %vm1672_vm9, %v863_v52  ;;  %v751_v50 = vadd.f32 %v750_v44, %v749_v42  ;;  %v758_v54 = vadd.f32 %v757_v61, %v756_v34  ;;  %v741_v59 = vadd.f32 %v740_v49, %v739_v19  ;;  %v713_v52 = vmul.f32 %v672_v6, %v1516_v17  ;;  %v682_v44 = vpop.permute.xlu0 %681  ;;  %v1782_v17 = vld [vmem:[#allocation11_spill] sm:$0xff] }
 0x240   : > { %v748_v62 = vadd.f32 %v747_v8, %v746_v26  ;;  %v647_v4 = vpop.permute.xlu1 %646  ;;  %v1779_v8 = vld [vmem:[#allocation8_spill] sm:$0xff] }
 0x241   : > { %v752_v21 = vrot.slane %v751_v50, 2  ;;  %v759_v23 = vrot.slane %v758_v54, 2  ;;  %v703_v13 = vmul.f32 %v647_v4, %v1450_v35  ;;  %v704_v27 = vmul.f32 %v647_v4, %v1453_v36 }
 0x242   : > { %v864_v14 = vcombine.low %v741_v59, %v748_v62 }
 0x243   : > { %v753_v10 = vadd.f32 %v752_v21, %v751_v50  ;;  %v760_v28 = vadd.f32 %v759_v23, %v758_v54  ;;  %v763_v0 = vadd.f32 %v703_v13, %v701_v24  ;;  %v770_v2 = vadd.f32 %v704_v27, %v702_v51 }
 0x244   : > { %v871_v29 = vrot.slane %v864_v14, %v1659_v7  ;;  %v652_v31 = vpop.permute.xlu1 %651  ;;  %v714_v50 = vmul.f32 %v672_v6, %v1779_v8  ;;  %v717_v23 = vmul.f32 %v682_v44, %v1782_v17 }
 0x245   : > { %v754_v37 = vrot.slane %v753_v10, 1  ;;  %v761_v32 = vrot.slane %v760_v28, 1  ;;  %v764_v38 = vrot.slane %v763_v0, 4  ;;  %v771_v22 = vrot.slane %v770_v2, 4 }
 0x246   : > { %v878_v60 = vrot.slane %v871_v29, %v1659_v7  ;;  %v705_v53 = vmul.f32 %v652_v31, %v1476_v47  ;;  %v706_v3 = vmul.f32 %v652_v31, %v1479_v48 }
 0x247   : > { %v755_v15 = vadd.f32 %v754_v37, %v753_v10  ;;  %v762_v35 = vadd.f32 %v761_v32, %v760_v28  ;;  %v765_v41 = vadd.f32 %v764_v38, %v763_v0  ;;  %v772_v36 = vadd.f32 %v771_v22, %v770_v2  ;;  %v1783_v2 = vld [vmem:[#allocation12_spill] sm:$0xff] }
 0x248   : > { %982 = vst.msk [vmem:[%s1669_s5 + $0x2] sm:$0x3] %vm1672_vm9, %v878_v60  ;;  %v657_v5 = vpop.permute.xlu1 %656  ;;  %v718_v29 = vmul.f32 %v682_v44, %v1783_v2 }
 0x249   : > { %v879_v43 = vcombine.low %v755_v15, %v762_v35  ;;  %v766_v11 = vrot.slane %v765_v41, 2  ;;  %v773_v12 = vrot.slane %v772_v36, 2  ;;  %v707_v18 = vmul.f32 %v657_v5, %v1470_v45 }
 0x24a   : > { %v708_v63 = vmul.f32 %v657_v5, %v1473_v46  ;;  %v710_v45 = vmul.f32 %v662_v9, %v1499_v58  ;;  %v1784_v5 = vld [vmem:[#allocation9_spill] sm:$0xff] }
 0x24b   : > { %v886_v30 = vrot.slane %v879_v43, %v1659_v7  ;;  %v767_v16 = vadd.f32 %v766_v11, %v765_v41  ;;  %v774_v39 = vadd.f32 %v773_v12, %v772_v36  ;;  %v777_v33 = vadd.f32 %v707_v18, %v705_v53  ;;  %v1785_v18 = vld [vmem:[#allocation10_spill] sm:$0xff] }
 0x24c   : > { %v784_v47 = vadd.f32 %v708_v63, %v706_v3  ;;  %v667_v42 = vpop.permute.xlu1 %666 }
 0x24d   : > { %v893_v34 = vrot.slane %v886_v30, %v1659_v7  ;;  %v768_v25 = vrot.slane %v767_v16, 1  ;;  %v775_v19 = vrot.slane %v774_v39, 1  ;;  %v778_v26 = vrot.slane %v777_v33, 4 }
 0x24e   : > { %v785_v48 = vrot.slane %v784_v47, 4  ;;  %v711_v46 = vmul.f32 %v667_v42, %v1490_v55  ;;  %v712_v20 = vmul.f32 %v667_v42, %v1493_v56  ;;  %v1780_v55 = vld [vmem:[#allocation6_spill] sm:$0xff]  ;;  %v1781_v56 = vld [vmem:[#allocation7_spill] sm:$0xff] }
 0x24f   : > { %983 = vst.msk [vmem:[%s1669_s5 + $0x4] sm:$0x3] %vm1672_vm9, %v893_v34  ;;  %v769_v57 = vadd.f32 %v768_v25, %v767_v16  ;;  %v776_v61 = vadd.f32 %v775_v19, %v774_v39  ;;  %v779_v49 = vadd.f32 %v778_v26, %v777_v33 }
 0x250   : > { %v786_v54 = vadd.f32 %v785_v48, %v784_v47  ;;  %v791_v59 = vadd.f32 %v711_v46, %v709_v1  ;;  %v798_v62 = vadd.f32 %v712_v20, %v710_v45  ;;  %v677_v58 = vpop.permute.xlu1 %676 }
 0x251   : > { %v894_v24 = vcombine.low %v769_v57, %v776_v61  ;;  %v780_v51 = vrot.slane %v779_v49, 2  ;;  %v715_v4 = vmul.f32 %v677_v58, %v1780_v55  ;;  %v716_v21 = vmul.f32 %v677_v58, %v1781_v56 }
 0x252   : > { %v787_v13 = vrot.slane %v786_v54, 2  ;;  %v792_v27 = vrot.slane %v791_v59, 4  ;;  %v799_v14 = vrot.slane %v798_v62, 4 }
 0x253   : > { %v901_v9 = vrot.slane %v894_v24, %v1659_v7  ;;  %v781_v10 = vadd.f32 %v780_v51, %v779_v49  ;;  %v805_v28 = vadd.f32 %v715_v4, %v713_v52  ;;  %v812_v0 = vadd.f32 %v716_v21, %v714_v50 }
 0x254   : > { %v788_v31 = vadd.f32 %v787_v13, %v786_v54  ;;  %v793_v37 = vadd.f32 %v792_v27, %v791_v59  ;;  %v800_v32 = vadd.f32 %v799_v14, %v798_v62  ;;  %v687_v38 = vpop.permute.xlu1 %686 }
 0x255   : > { %v908_v22 = vrot.slane %v901_v9, %v1659_v7  ;;  %v782_v60 = vrot.slane %v781_v10, 1  ;;  %v806_v15 = vrot.slane %v805_v28, 4  ;;  %v813_v35 = vrot.slane %v812_v0, 4 }
 0x256   : > { %v789_v41 = vrot.slane %v788_v31, 1  ;;  %v794_v36 = vrot.slane %v793_v37, 2  ;;  %v801_v53 = vrot.slane %v800_v32, 2  ;;  %v719_v6 = vmul.f32 %v687_v38, %v1784_v5 }
 0x257   : > { %984 = vst.msk [vmem:[%s1669_s5 + $0x6] sm:$0x3] %vm1672_vm9, %v908_v22  ;;  %v783_v43 = vadd.f32 %v782_v60, %v781_v10  ;;  %v807_v11 = vadd.f32 %v806_v15, %v805_v28  ;;  %v814_v12 = vadd.f32 %v813_v35, %v812_v0  ;;  %v720_v3 = vmul.f32 %v687_v38, %v1785_v18 }
 0x258   : > { %v790_v63 = vadd.f32 %v789_v41, %v788_v31  ;;  %v795_v30 = vadd.f32 %v794_v36, %v793_v37  ;;  %v802_v16 = vadd.f32 %v801_v53, %v800_v32  ;;  %v819_v39 = vadd.f32 %v719_v6, %v717_v23 }
 0x259   : > { %v808_v33 = vrot.slane %v807_v11, 2  ;;  %v815_v1 = vrot.slane %v814_v12, 2  ;;  %v826_v47 = vadd.f32 %v720_v3, %v718_v29 }
 0x25a   : > { %v909_v42 = vcombine.low %v783_v43, %v790_v63  ;;  %v796_v34 = vrot.slane %v795_v30, 1  ;;  %v803_v25 = vrot.slane %v802_v16, 1  ;;  %v820_v19 = vrot.slane %v819_v39, 4 }
 0x25b   : > { %v809_v26 = vadd.f32 %v808_v33, %v807_v11  ;;  %v816_v45 = vadd.f32 %v815_v1, %v814_v12  ;;  %v827_v48 = vrot.slane %v826_v47, 4 }
 0x25c   : > { %v916_v46 = vrot.slane %v909_v42, %v1659_v7  ;;  %v797_v20 = vadd.f32 %v796_v34, %v795_v30  ;;  %v804_v52 = vadd.f32 %v803_v25, %v802_v16  ;;  %v821_v44 = vadd.f32 %v820_v19, %v819_v39 }
 0x25d   : > { %v810_v57 = vrot.slane %v809_v26, 1  ;;  %v817_v61 = vrot.slane %v816_v45, 1  ;;  %v828_v49 = vadd.f32 %v827_v48, %v826_v47 }
 0x25e   : > { %v923_v8 = vrot.slane %v916_v46, %v1659_v7  ;;  %v924_v50 = vcombine.low %v797_v20, %v804_v52  ;;  %v822_v54 = vrot.slane %v821_v44, 2 }
 0x25f   : > { %v811_v59 = vadd.f32 %v810_v57, %v809_v26  ;;  %v818_v62 = vadd.f32 %v817_v61, %v816_v45  ;;  %v829_v58 = vrot.slane %v828_v49, 2 }
 0x260   : > { %985 = vst.msk [vmem:[%s1669_s5 + $0x8] sm:$0x3] %vm1672_vm9, %v923_v8  ;;  %v931_v24 = vrot.slane %v924_v50, %v1659_v7  ;;  %v823_v51 = vadd.f32 %v822_v54, %v821_v44 }
 0x261   : > { %v939_v55 = vcombine.low %v811_v59, %v818_v62  ;;  %v830_v4 = vadd.f32 %v829_v58, %v828_v49 }
 0x262   : > { %v938_v56 = vrot.slane %v931_v24, %v1659_v7  ;;  %v824_v21 = vrot.slane %v823_v51, 1 }
 0x263   : > { %v946_v17 = vrot.slane %v939_v55, %v1659_v7  ;;  %v831_v23 = vrot.slane %v830_v4, 1 }
 0x264   : > { %986 = vst.msk [vmem:[%s1669_s5 + $0xa] sm:$0x3] %vm1672_vm9, %v938_v56  ;;  %v825_v13 = vadd.f32 %v824_v21, %v823_v51 }
 0x265   : > { %v953_v27 = vrot.slane %v946_v17, %v1659_v7  ;;  %v832_v14 = vadd.f32 %v831_v23, %v830_v4 }
 0x267   : > { %987 = vst.msk [vmem:[%s1669_s5 + $0xc] sm:$0x3] %vm1672_vm9, %v953_v27  ;;  %v954_v9 = vcombine.low %v825_v13, %v832_v14 }
 0x269   : > { %v961_v10 = vrot.slane %v954_v9, %v1659_v7 }
 0x26b   : > { %v968_v28 = vrot.slane %v961_v10, %v1659_v7 }
 0x26d   : > { %988 = vst.msk [vmem:[%s1669_s5 + $0xe] sm:$0x3] %vm1672_vm9, %v968_v28 }
 0x26e PF: > { %p14_p9 = scmp.ge.s32.totalorder %s1309_s18, 4   ;;  %s1786_s14 = smov %s1251_s15 }
 0x26f   : > { %s1787_s15 = smov %s1255_s16  ;;  %s1788_s16 = smov %s1319_s21 }
 0x270   : > { %s1789_s17 = smov %s1309_s18  ;;  %16 = sbr.rel (!%p14_p9) target bundleno = 5 (0x5), region = 72 }
 0x275   :  { %1011 = vsyncpa [#allocation4], 1 }
 0x276   :  { %1013 = vsyncpa [#allocation4 + $0x1], 1 }

</bundles_post_ra>
